<compile_context>
chip_gen: v6e
topology: v6e:2x2x1
jax: 0.10.0
libtpu: 0.0.40
codegen_flags: <defaults>
</compile_context>

<pallas_src>
import jax
import jax.numpy as jnp
from jax import lax
from jax.experimental import pallas as pl
from jax.experimental.pallas import tpu as pltpu


def _round_up(x, m):
    return (x + m - 1) // m * m


def _linear_sigmoid_kernel(x_ref, w_ref, b_ref, o_ref, acc_ref):
    """Computes one (tm, tn) output tile; grid axis 2 is the K reduction."""
    k = pl.program_id(2)

    @pl.when(k == 0)
    def _init():
        acc_ref[...] = jnp.zeros_like(acc_ref)

    # x_ref: (tm, tk); w_ref: (tn, tk) in PyTorch (out, in) layout.
    # Contract over the shared K dim directly -> no transposed weight copy.
    acc_ref[...] += lax.dot_general(
        x_ref[...],
        w_ref[...],
        dimension_numbers=(((1,), (1,)), ((), ())),
        preferred_element_type=jnp.float32,
    )

    @pl.when(k == pl.num_programs(2) - 1)
    def _finalize():
        z = acc_ref[...] + b_ref[...].astype(jnp.float32)
        o_ref[...] = jax.nn.sigmoid(z).astype(o_ref.dtype)


def traditional_linear(x, weight, bias, *, mxu_dtype=None,
                       tm_max=256, tn_max=256, tk_max=512):
    """sigmoid(x @ weight.T + bias); eval-mode dropout == identity.

    x:      (B, in_f)
    weight: (out_f, in_f)  -- PyTorch nn.Linear layout (NOT pre-transposed)
    bias:   (out_f,)
    mxu_dtype: optionally cast the MXU operands (e.g. jnp.bfloat16 on
               v6e/v7x); accumulation and the sigmoid epilogue stay in f32.
    """
    B, in_f = x.shape
    out_f, in_f_w = weight.shape
    assert in_f == in_f_w, "weight must be (out_features, in_features)"
    out_dtype = x.dtype

    # Tile sizes: VMEM-budgeted for v7x (64 MiB phys / 32 MiB scoped default):
    # 2 bufs * (tm*tk + tn*tk + tm*tn) * 4B  <<  32 MiB at 256/256/512.
    tm = tm_max if B >= tm_max else _round_up(B, 8)
    tn = tn_max if out_f >= tn_max else _round_up(out_f, 128)
    tk = tk_max if in_f >= tk_max else _round_up(in_f, 128)

    # Pad everything to whole tiles (lane-dense output: last dims are
    # multiples of 128 -> unmasked vst, fully fed MXU). Padded K columns are
    # zero in both x and W so they do not perturb the dot product.
    Bp = _round_up(B, tm)
    Np = _round_up(out_f, tn)
    Kp = _round_up(in_f, tk)

    xp = jnp.pad(x, ((0, Bp - B), (0, Kp - in_f)))
    wp = jnp.pad(weight, ((0, Np - out_f), (0, Kp - in_f)))
    bp = jnp.pad(bias, (0, Np - out_f)).reshape(1, Np)

    if mxu_dtype is not None:
        xp = xp.astype(mxu_dtype)
        wp = wp.astype(mxu_dtype)

    grid = (Bp // tm, Np // tn, Kp // tk)

    out_p = pl.pallas_call(
        _linear_sigmoid_kernel,
        out_shape=jax.ShapeDtypeStruct((Bp, Np), out_dtype),
        grid_spec=pltpu.PrefetchScalarGridSpec(
            num_scalar_prefetch=0,
            grid=grid,
            in_specs=[
                pl.BlockSpec((tm, tk), lambda i, j, k: (i, k)),   # x tile
                pl.BlockSpec((tn, tk), lambda i, j, k: (j, k)),   # W tile
                pl.BlockSpec((1, tn), lambda i, j, k: (0, j)),    # bias tile
            ],
            out_specs=pl.BlockSpec((tm, tn), lambda i, j, k: (i, j)),
            scratch_shapes=[pltpu.VMEM((tm, tn), jnp.float32)],
        ),
        compiler_params=pltpu.CompilerParams(
            dimension_semantics=("parallel", "parallel", "arbitrary"),
        ),
    )(xp, wp, bp)

    # Slice off the padded rows/columns (padded cols = sigmoid(0) garbage).
    return out_p[:B, :out_f]


if __name__ == "__main__":
    # Shapes consistent with the module: batch=8, in_features=32, out_features=16
    B, IN_F, OUT_F = 8, 32, 16
    dropout_p = 0.1  # unused in eval mode

    key = jax.random.PRNGKey(0)
    kx, kw, kb = jax.random.split(key, 3)

    x = jax.random.normal(kx, (B, IN_F), dtype=jnp.float32)

    # Deterministic nn.Linear-style init: U(-1/sqrt(in_f), 1/sqrt(in_f))
    bound = 1.0 / (IN_F ** 0.5)
    weight = jax.random.uniform(kw, (OUT_F, IN_F), jnp.float32, -bound, bound)
    bias = jax.random.uniform(kb, (OUT_F,), jnp.float32, -bound, bound)

    ref = jax.nn.sigmoid(x @ weight.T + bias)

    # f32 MXU-operand path (matches the plain-JAX reference tightly).
    out = traditional_linear(x, weight, bias)
    jax.block_until_ready(out)
    assert out.shape == (B, OUT_F)
    assert jnp.allclose(out, ref, atol=1e-5, rtol=1e-5)

    # bf16 MXU-operand path (recommended on v6e/v7x); f32 accumulation keeps
    # the error small -> looser tolerance.
    out_bf16 = traditional_linear(x, weight, bias, mxu_dtype=jnp.bfloat16)
    jax.block_until_ready(out_bf16)
    assert out_bf16.shape == (B, OUT_F)
    assert jnp.allclose(out_bf16, ref, atol=3e-2, rtol=3e-2)

    # Larger shape exercising the multi-tile grid + K-reduction accumulator.
    B2, IN2, OUT2 = 512, 1024, 384
    kx2, kw2, kb2 = jax.random.split(jax.random.PRNGKey(1), 3)
    x2 = jax.random.normal(kx2, (B2, IN2), dtype=jnp.float32)
    w2 = jax.random.normal(kw2, (OUT2, IN2), dtype=jnp.float32) * 0.02
    b2 = jax.random.normal(kb2, (OUT2,), dtype=jnp.float32)
    out2 = traditional_linear(x2, w2, b2)
    jax.block_until_ready(out2)
    ref2 = jax.nn.sigmoid(x2 @ w2.T + b2)
    assert out2.shape == (B2, OUT2)
    assert jnp.allclose(out2, ref2, atol=5e-3, rtol=5e-3)

    print("KERNEL_OK")
</pallas_src>

<mosaic_0001>
module attributes {stable_mosaic.version = 11 : i64} {
  func.func @_linear_sigmoid_kernel(%arg0: i32, %arg1: i32, %arg2: i32, %arg3: memref<8x128xf32, #tpu.memory_space<vmem>>, %arg4: memref<128x128xf32, #tpu.memory_space<vmem>>, %arg5: memref<1x128xf32, #tpu.memory_space<vmem>>, %arg6: memref<8x128xf32, #tpu.memory_space<vmem>>, %arg7: memref<8x128xf32, #tpu.memory_space<vmem>>) attributes {dimension_semantics = [#tpu.dimension_semantics<parallel>, #tpu.dimension_semantics<parallel>, #tpu.dimension_semantics<arbitrary>], iteration_bounds = array<i64: 1, 1, 1>, scalar_prefetch = 0 : i64, scratch_operands = 1 : i64, tpu.core_type = #tpu.core_type<tc>, window_params = [{transform_indices = @transform_0, window_bounds = array<i64: 8, 128>}, {transform_indices = @transform_1, window_bounds = array<i64: 128, 128>}, {transform_indices = @transform_2, window_bounds = array<i64: 1, 128>}, {transform_indices = @transform_3, window_bounds = array<i64: 8, 128>}]} {
    %c0_i32 = arith.constant 0 : i32
    %0 = arith.cmpi eq, %arg2, %c0_i32 : i32
    %1 = arith.extui %0 : i1 to i32
    %c0_i32_0 = arith.constant 0 : i32
    %2 = arith.cmpi ne, %1, %c0_i32_0 : i32
    scf.if %2 {
      %cst_10 = arith.constant 0.000000e+00 : f32
      %12 = vector.broadcast %cst_10 : f32 to vector<8x128xf32>
      %c0_11 = arith.constant 0 : index
      %c0_12 = arith.constant 0 : index
      %13 = vector.load %arg7[%c0_11, %c0_12] : memref<8x128xf32, #tpu.memory_space<vmem>>, vector<8x128xf32>
      tpu.vector_store %arg7[%c0_11, %c0_12], %12 {strides = array<i32>} : memref<8x128xf32, #tpu.memory_space<vmem>>, vector<8x128xf32>,
    } else {
    }
    %c0 = arith.constant 0 : index
    %c0_1 = arith.constant 0 : index
    %3 = vector.load %arg7[%c0, %c0_1] : memref<8x128xf32, #tpu.memory_space<vmem>>, vector<8x128xf32>
    %c0_2 = arith.constant 0 : index
    %c0_3 = arith.constant 0 : index
    %4 = vector.load %arg3[%c0_2, %c0_3] : memref<8x128xf32, #tpu.memory_space<vmem>>, vector<8x128xf32>
    %c0_4 = arith.constant 0 : index
    %c0_5 = arith.constant 0 : index
    %5 = vector.load %arg4[%c0_4, %c0_5] : memref<128x128xf32, #tpu.memory_space<vmem>>, vector<128x128xf32>
    %cst = arith.constant dense<0.000000e+00> : vector<8x128xf32>
    %6 = tpu.matmul %4, %5, %cst {dimension_numbers = #tpu.dot_dimension_numbers<[1], [1], [0], [0], [0, 0, 1, 0], [], []>} : vector<8x128xf32>, vector<128x128xf32>, vector<8x128xf32> -> vector<8x128xf32>
    %7 = arith.addf %3, %6 : vector<8x128xf32>
    %c0_6 = arith.constant 0 : index
    %c0_7 = arith.constant 0 : index
    %8 = vector.load %arg7[%c0_6, %c0_7] : memref<8x128xf32, #tpu.memory_space<vmem>>, vector<8x128xf32>
    tpu.vector_store %arg7[%c0_6, %c0_7], %7 {strides = array<i32>} : memref<8x128xf32, #tpu.memory_space<vmem>>, vector<8x128xf32>,
    %c0_i32_8 = arith.constant 0 : i32
    %9 = arith.cmpi eq, %arg2, %c0_i32_8 : i32
    %10 = arith.extui %9 : i1 to i32
    %c0_i32_9 = arith.constant 0 : i32
    %11 = arith.cmpi ne, %10, %c0_i32_9 : i32
    scf.if %11 {
      %c0_10 = arith.constant 0 : index
      %c0_11 = arith.constant 0 : index
      %12 = vector.load %arg7[%c0_10, %c0_11] : memref<8x128xf32, #tpu.memory_space<vmem>>, vector<8x128xf32>
      %c0_12 = arith.constant 0 : index
      %c0_13 = arith.constant 0 : index
      %13 = vector.load %arg5[%c0_12, %c0_13] : memref<1x128xf32, #tpu.memory_space<vmem>>, vector<1x128xf32>
      %14 = vector.broadcast %13 : vector<1x128xf32> to vector<8x128xf32>
      %15 = arith.addf %12, %14 : vector<8x128xf32>
      %16 = arith.negf %15 : vector<8x128xf32>
      %17 = math.exp %16 : vector<8x128xf32>
      %cst_14 = arith.constant 1.000000e+00 : f32
      %18 = vector.broadcast %cst_14 : f32 to vector<8x128xf32>
      %19 = arith.addf %18, %17 : vector<8x128xf32>
      %20 = arith.divf %18, %19 : vector<8x128xf32>
      %c0_15 = arith.constant 0 : index
      %c0_16 = arith.constant 0 : index
      %21 = vector.load %arg6[%c0_15, %c0_16] : memref<8x128xf32, #tpu.memory_space<vmem>>, vector<8x128xf32>
      tpu.vector_store %arg6[%c0_15, %c0_16], %20 {strides = array<i32>} : memref<8x128xf32, #tpu.memory_space<vmem>>, vector<8x128xf32>,
    } else {
    }
    return
  }
  func.func @transform_0(%arg0: i32, %arg1: i32, %arg2: i32) -> (i32, i32) {
    %c0_i32 = arith.constant 0 : i32
    return %arg0, %arg2 : i32, i32
  }
  func.func @transform_1(%arg0: i32, %arg1: i32, %arg2: i32) -> (i32, i32) {
    %c0_i32 = arith.constant 0 : i32
    return %arg1, %arg2 : i32, i32
  }
  func.func @transform_2(%arg0: i32, %arg1: i32, %arg2: i32) -> (i32, i32) {
    %c0_i32 = arith.constant 0 : i32
    %c0_i32_0 = arith.constant 0 : i32
    return %c0_i32, %arg1 : i32, i32
  }
  func.func @transform_3(%arg0: i32, %arg1: i32, %arg2: i32) -> (i32, i32) {
    %c0_i32 = arith.constant 0 : i32
    return %arg0, %arg1 : i32, i32
  }
}

</mosaic_0001>

<bundles_post_ra>
// kernel: tpu_custom_call.1
= control target key start
LH: loop header
LB: loop body
LE: loop exit
PB: predicated region body
PF: predicated region fallthrough
CT: control target
= control target key end

     0   :  { %8 = vsyncpa [#allocation4], 0  ;;  %s341_s0 = inlined_call_operand.hbm [shape: f32[8,128], index: 0, kind: input, shape index: {}]   ;;  %s342_s1 = inlined_call_operand.hbm [shape: f32[128,128], index: 1, kind: input, shape index: {}]   ;;  %s343_s2 = inlined_call_operand.vmem [shape: f32[1,128], index: 2, kind: input, shape index: {}]   ;;  %s344_s3 = inlined_call_operand.hbm [shape: f32[8,128], index: 3, kind: output, shape index: {}]  }
   0x1   :  { %9 = vsyncpa [#allocation7], 0 }
   0x2   :  { %10 = vsyncpa [#allocation5], 0  ;;  %s302_s12 = smov [#allocation3]   ;;  %s303_s14 = smov [#allocation6]  }
   0x3   :  { %s17_s13 = sshll.u32 %s302_s12, 4  ;;  %s26_s15 = sshll.u32 %s303_s14, 4  ;;  %s18_s13 = int_to_ptr.vmem [resolvable:$true] %s17_s13  ;;  %s27_s15 = int_to_ptr.vmem [resolvable:$true] %s26_s15 }
   0x4   :  { %s244_s16 = scalar_lea.vmem %s18_s13, 128  ;;  %p249_p1 = scmp.lt.s32.totalorder %s18_s13, %s18_s13 }
   0x5   :  { %p245_p0 = scmp.ne.s32.totalorder %s18_s13, %s244_s16  ;;  %p250_p2 = scmp.lt.s32.totalorder %s244_s16, %s244_s16 }
   0x7   :  { %p251_p3 = por %p250_p2, %p249_p1 }
   0x9   :  { %p252_p4 = pnand %p251_p3, %p245_p0 }
   0xb   :  { %255 = shalt.err (!%p252_p4)
}
   0xc   :  { %20 = dma.hbm_to_vmem [thread:$0]  %s341_s0, 128, %s18_s13, [#allocation4]  }
   0xd   :  { %s264_s19 = scalar_lea.vmem %s27_s15, 2048  ;;  %p269_p6 = scmp.lt.s32.totalorder %s27_s15, %s27_s15 }
   0xe   :  { %p265_p5 = scmp.ne.s32.totalorder %s27_s15, %s264_s19  ;;  %p270_p7 = scmp.lt.s32.totalorder %s264_s19, %s264_s19 }
  0x10   :  { %p271_p8 = por %p270_p7, %p269_p6 }
  0x12   :  { %p272_p9 = pnand %p271_p8, %p265_p5 }
  0x14   :  { %275 = shalt.err (!%p272_p9)
}
  0x15   :  { %s304_s20 = smov 128   ;;  %s305_s21 = smov 8  }
  0x16   :  { %32 = dma.hbm_to_vmem [thread:$0]  %s342_s1, 2048, %s27_s15, [#allocation7], %s304_s20, %s304_s20, %s305_s21  }
  0x17   :  { %296 = dma.done.wait [#allocation4], 128  }
  0x18   :  { %297 = vsyncadd [#allocation4], 4294967168 }
  0x19   :  { %298 = dma.done.wait [#allocation7], 2048  }
  0x1a   :  { %299 = vsyncadd [#allocation7], 4294965248  ;;  %v306_v0 = vmov 0.0   ;;  %vm307_vm0 = vmmov 0   ;;  %v63_v1 = vld [vmem:[#allocation6 + $0x78] sm:$0xff]  ;;  %v62_v2 = vld [vmem:[#allocation6 + $0x70] sm:$0xff] }
  0x1b   :  { %190 = vmatprep.subr.mxu0 %v306_v0  ;;  %222 = vmatprep.mubr.msk.f32.mxu0 %vm307_vm0, %v306_v0  ;;  %v61_v3 = vld [vmem:[#allocation6 + $0x68] sm:$0xff]  ;;  %v60_v4 = vld [vmem:[#allocation6 + $0x60] sm:$0xff]  ;;  %v59_v5 = vld [vmem:[#allocation6 + $0x58] sm:$0xff]  ;;  %s308_s24 = smov [#allocation8]  }
  0x1c   :  { %191 = vmatpush3.xpose.msra.mxu0 %v63_v1  ;;  %v58_v6 = vld [vmem:[#allocation6 + $0x50] sm:$0xff]  ;;  %v57_v7 = vld [vmem:[#allocation6 + $0x48] sm:$0xff]  ;;  %v56_v8 = vld [vmem:[#allocation6 + $0x40] sm:$0xff]  ;;  %s161_s25 = sshll.u32 %s308_s24, 4  ;;  %s162_s25 = int_to_ptr.vmem [resolvable:$true] %s161_s25 }
  0x1d   :  { %192 = vmatprep.subr.mxu0 %v306_v0  ;;  %v55_v9 = vld [vmem:[#allocation6 + $0x38] sm:$0xff]  ;;  %v54_v10 = vld [vmem:[#allocation6 + $0x30] sm:$0xff]  ;;  %v53_v11 = vld [vmem:[#allocation6 + $0x28] sm:$0xff]  ;;  %s276_s26 = scalar_lea.vmem %s162_s25, 128  ;;  %p281_p11 = scmp.lt.s32.totalorder %s162_s25, %s162_s25 }
  0x1e   :  { %v52_v12 = vld [vmem:[#allocation6 + $0x20] sm:$0xff]  ;;  %v51_v13 = vld [vmem:[#allocation6 + $0x18] sm:$0xff]  ;;  %v50_v14 = vld [vmem:[#allocation6 + $0x10] sm:$0xff]  ;;  %p277_p10 = scmp.ne.s32.totalorder %s162_s25, %s276_s26  ;;  %p282_p12 = scmp.lt.s32.totalorder %s276_s26, %s276_s26 }
  0x1f   :  { %v49_v15 = vld [vmem:[#allocation6 + $0x8] sm:$0xff]  ;;  %v48_v16 = vld [vmem:[#allocation6] sm:$0xff]  ;;  %v47_v17 = vld [vmem:[#allocation3] sm:$0xff] }
  0x20   :  { %193 = vmatpush3.xpose.msra.mxu0 %v62_v2  ;;  %v171_v18 = vld [vmem:[%s343_s2] ss:$0 sm:$0xff]  ;;  %p283_p13 = por %p282_p12, %p281_p11 }
  0x21   :  { %194 = vmatprep.subr.mxu0 %v306_v0 }
  0x22   :  { %p284_p0 = pnand %p283_p13, %p277_p10 }
  0x24   :  { %195 = vmatpush3.xpose.msra.mxu0 %v61_v3 }
  0x25   :  { %196 = vmatprep.subr.mxu0 %v306_v0 }
  0x28   :  { %197 = vmatpush3.xpose.msra.mxu0 %v60_v4 }
  0x29   :  { %198 = vmatprep.subr.mxu0 %v306_v0 }
  0x2c   :  { %199 = vmatpush3.xpose.msra.mxu0 %v59_v5 }
  0x2d   :  { %200 = vmatprep.subr.mxu0 %v306_v0 }
  0x30   :  { %201 = vmatpush3.xpose.msra.mxu0 %v58_v6 }
  0x31   :  { %202 = vmatprep.subr.mxu0 %v306_v0 }
  0x34   :  { %203 = vmatpush3.xpose.msra.mxu0 %v57_v7 }
  0x35   :  { %204 = vmatprep.subr.mxu0 %v306_v0 }
  0x38   :  { %205 = vmatpush3.xpose.msra.mxu0 %v56_v8 }
  0x39   :  { %206 = vmatprep.subr.mxu0 %v306_v0 }
  0x3c   :  { %207 = vmatpush3.xpose.msra.mxu0 %v55_v9 }
  0x3d   :  { %208 = vmatprep.subr.mxu0 %v306_v0 }
  0x40   :  { %209 = vmatpush3.xpose.msra.mxu0 %v54_v10 }
  0x41   :  { %210 = vmatprep.subr.mxu0 %v306_v0 }
  0x44   :  { %211 = vmatpush3.xpose.msra.mxu0 %v53_v11 }
  0x45   :  { %212 = vmatprep.subr.mxu0 %v306_v0 }
  0x48   :  { %213 = vmatpush3.xpose.msra.mxu0 %v52_v12 }
  0x49   :  { %214 = vmatprep.subr.mxu0 %v306_v0 }
  0x4c   :  { %215 = vmatpush3.xpose.msra.mxu0 %v51_v13 }
  0x4d   :  { %216 = vmatprep.subr.mxu0 %v306_v0 }
  0x50   :  { %217 = vmatpush3.xpose.msra.mxu0 %v50_v14 }
  0x51   :  { %218 = vmatprep.subr.mxu0 %v306_v0 }
  0x54   :  { %219 = vmatpush3.xpose.msra.mxu0 %v49_v15 }
  0x55   :  { %220 = vmatprep.subr.mxu0 %v306_v0 }
  0x58   :  { %221 = vmatpush3.xpose.msra.mxu0 %v48_v16 }
  0x5b   :  { %223 = vmatmul.mubr.f32.vlgmr.msra.gmra.mxu0 %v47_v17 }
 0x11b   :  { %v130_v19 = vpop.f32.mrf.mxu0 }
 0x11c   :  { %v147_v20 = vadd.f32 %v171_v18, %v130_v19 }
 0x11d   :  { %v224_v21 = vpop.f32.mrf.mxu0 }
 0x11e   :  { %v172_v22 = vmul.f32 -1.442695, %v147_v20 }
 0x120   :  { %232 = vpow2.f32 %v172_v22 }
 0x12d   :  { %v233_v23 = vpop.eup %232 }
 0x12e   :  { %v151_v24 = vadd.f32 1.0, %v233_v23 }
 0x130   :  { %234 = vrcp.f32 %v151_v24 }
 0x13d   :  { %v235_v25 = vpop.eup %234 }
 0x13e   :  { %154 = vst [vmem:[#allocation8] sm:$0xff] %v235_v25 }
 0x13f   :  { %287 = shalt.err (!%p284_p0)
}
 0x140   :  { %164 = dma.vmem_to_hbm [thread:$0]  %s162_s25, 128, %s344_s3, [#allocation5]  }
 0x141   :  { %300 = dma.done.wait [#allocation5], 128  }
 0x142   :  { %301 = vsyncadd [#allocation5], 4294967168 }
 0x143   :  { %168 = vsyncpa [#allocation4], 1 }
 0x144   :  { %169 = vsyncpa [#allocation7], 1 }
 0x145   :  { %170 = vsyncpa [#allocation5], 1 }

</bundles_post_ra>
